<compile_context>
chip_gen: v5e
topology: v5e:2x2
jax: 0.10.0
libtpu: 0.0.40
codegen_flags: <defaults>
</compile_context>

<pallas_src>
import jax
import jax.numpy as jnp
from jax import lax
from jax.experimental import pallas as pl
from jax.experimental.pallas import tpu as pltpu

_LANES = 128
_SUBLANES = 8


def _cdiv(a, b):
    return -(-a // b)


def _round_down(x, m):
    return (x // m) * m


# ---------------------------------------------------------------------------
# Distance map (SurfaceLoss.one_hot2dist) -- plain JAX, not Pallas.
# ---------------------------------------------------------------------------
def _edt(mask):
    """Exact Euclidean distance transform (scipy.distance_transform_edt
    semantics): distance to the nearest False pixel; 0 on False pixels.
    Exact separable two-pass formulation, O(H^2*W + H*W^2)."""
    h, w = mask.shape
    big = jnp.float32(1e12)
    bg = jnp.logical_not(mask)
    # Pass 1 (vertical): g[i, j] = min_{i' : bg[i', j]} |i - i'|
    ii = jnp.arange(h, dtype=jnp.float32)
    di = jnp.abs(ii[:, None] - ii[None, :])                              # (H, H')
    g = jnp.min(jnp.where(bg[None, :, :], di[:, :, None], big), axis=1)  # (H, W)
    # Pass 2 (horizontal): d2[i, j] = min_{j'} (j - j')^2 + g[i, j']^2
    jj = jnp.arange(w, dtype=jnp.float32)
    dj2 = (jj[:, None] - jj[None, :]) ** 2                               # (W', W)
    d2 = jnp.min(g[:, :, None] ** 2 + dj2[None, :, :], axis=1)           # (H, W)
    # TODO(synk): scipy's behaviour for an all-foreground mask (no background
    # pixel) is implementation-defined; we define the transform as 0 there.
    return jnp.where(jnp.any(bg), jnp.sqrt(d2), jnp.zeros_like(d2))


def _one_hot2dist(label):
    """SurfaceLoss dist map for [N, 1, H, W] binary labels (resolution [1,1]).
    TODO(synk): the reference computes this with scipy's distance_transform_edt
    on CPU; here it is done in plain JAX (exact EDT) before the Pallas kernel.
    For very large images consider precomputing host-side."""
    def per_sample(seg):                                   # (1, H, W)
        posmask = seg[0] > 0.5
        negmask = jnp.logical_not(posmask)
        posf = posmask.astype(jnp.float32)
        negf = negmask.astype(jnp.float32)
        res = _edt(negmask) * negf - (_edt(posmask) - 1.0) * posf
        return jnp.where(jnp.any(posmask), res, jnp.zeros_like(res))[None]
    return jax.vmap(per_sample)(label)


# ---------------------------------------------------------------------------
# Pallas kernel: streaming per-sample partial sums.
# ---------------------------------------------------------------------------
def _make_partial_sums_kernel(tile_r, r_rows, num_k):
    needs_row_mask = num_k * tile_r > r_rows
    vreg_rows = (tile_r % _SUBLANES) == 0    # per-sublane accumulators possible

    def kernel(p_ref, t_ref, d_ref, inter_ref, denom_ref, surf_ref):
        k = pl.program_id(1)

        @pl.when(k == 0)
        def _init():
            inter_ref[...] = jnp.zeros_like(inter_ref)
            denom_ref[...] = jnp.zeros_like(denom_ref)
            surf_ref[...] = jnp.zeros_like(surf_ref)

        p = p_ref[...].astype(jnp.float32)   # (tile_n, tile_r, 128)
        t = t_ref[...].astype(jnp.float32)
        d = d_ref[...].astype(jnp.float32)

        def accumulate(p, t, d):
            tn = p.shape[0]
            if vreg_rows:
                # Fold tile_r -> (tile_r/8, 8): layout-preserving split of the
                # sublane axis, so the per-step reduction is pure vreg-wise
                # VPU adds (no intra-vreg XLU reduce in the hot loop); the
                # 8x128 collapse happens once in the epilogue.
                shp = (tn, tile_r // _SUBLANES, _SUBLANES, _LANES)
                inter_ref[...] += jnp.sum((p * t).reshape(shp), axis=1)
                denom_ref[...] += jnp.sum((p + t).reshape(shp), axis=1)
                surf_ref[...] += jnp.sum((p * d).reshape(shp), axis=1)
            else:
                # Small single-chunk fallback (tile_r == full R, not 8-aligned).
                inter_ref[:, 0:1, :] += jnp.sum(p * t, axis=1, keepdims=True)
                denom_ref[:, 0:1, :] += jnp.sum(p + t, axis=1, keepdims=True)
                surf_ref[:, 0:1, :] += jnp.sum(p * d, axis=1, keepdims=True)

        if needs_row_mask:
            # Last chunk runs past the true row count: Pallas pads the block
            # with unspecified data, so select (not multiply -- the padding
            # may be NaN/Inf garbage) only on the final iteration.
            @pl.when(k < num_k - 1)
            def _body():
                accumulate(p, t, d)

            @pl.when(k == num_k - 1)
            def _tail():
                rows = lax.broadcasted_iota(jnp.int32, p.shape, 1)
                valid = rows < (r_rows - k * tile_r)
                zero = jnp.float32(0.0)
                accumulate(jnp.where(valid, p, zero),
                           jnp.where(valid, t, zero),
                           jnp.where(valid, d, zero))
        else:
            accumulate(p, t, d)

    return kernel


def _vmem_capacity_bytes():
    try:
        cap = getattr(pltpu.get_tpu_info(), "vmem_capacity_bytes", None)
        if cap:
            return int(cap)
    except Exception:
        pass
    return 64 << 20           # conservative default (v7x per-TensorCore)


def _partial_sums(p2, t2, d2, *, max_rows_per_block=None):
    """[N, L] inputs -> per-sample (sum(p*t), sum(p+t)) and global sum(p*d)."""
    n, l = p2.shape
    r_rows = _cdiv(l, _LANES)

    # Pad only up to a 128-lane multiple (a no-op for typical H*W); the ragged
    # row chunk is handled by in-kernel masking, not by materializing padded
    # copies of all three streams in HBM.
    pad = r_rows * _LANES - l
    if pad:
        # TODO(synk): this copy pass only triggers when C*H*W % 128 != 0.
        p2 = jnp.pad(p2, ((0, 0), (0, pad)))
        t2 = jnp.pad(t2, ((0, 0), (0, pad)))
        d2 = jnp.pad(d2, ((0, 0), (0, pad)))
    p3 = p2.reshape(n, r_rows, _LANES)
    t3 = t2.reshape(n, r_rows, _LANES)
    d3 = d2.reshape(n, r_rows, _LANES)

    # ---- tile sizing -------------------------------------------------------
    # Cap samples per block (largest divisor of N that is <= 8) so each
    # contiguous DMA run (one sample's rows) stays long even for large N.
    tile_n = max(c for c in range(1, min(n, _SUBLANES) + 1) if n % c == 0)
    n_blocks = n // tile_n

    itemsize_sum = p3.dtype.itemsize + t3.dtype.itemsize + d3.dtype.itemsize

    vmem_cap = _vmem_capacity_bytes()
    vmem_limit = max(32 << 20, min((vmem_cap * 3) // 4, 96 << 20))
    # Budget: double-buffered input blocks + 3 in-kernel f32 upcast temporaries.
    pipe_budget = min(vmem_limit - (8 << 20), 40 << 20)
    per_row_bytes = tile_n * _LANES * (2 * itemsize_sum + 3 * 4)
    tile_r = max(_SUBLANES, _round_down(pipe_budget // per_row_bytes, _SUBLANES))
    # ~3-4 MiB (f32-equivalent) per input block: on the HBM-roofline plateau,
    # with headroom for v7x's smaller per-core VMEM.
    per_input_cap = (4 << 20) if vmem_cap >= (96 << 20) else (3 << 20)
    cap_rows = max(_SUBLANES,
                   _round_down(per_input_cap // (tile_n * _LANES * 4), _SUBLANES))
    tile_r = min(tile_r, cap_rows)
    if max_rows_per_block is not None:       # test hook
        tile_r = min(tile_r, max(_SUBLANES, _round_down(max_rows_per_block, _SUBLANES)))
    if r_rows <= tile_r:
        tile_r = r_rows                      # full-dim block, no row masking
    num_k = _cdiv(r_rows, tile_r)

    in_spec = pl.BlockSpec((tile_n, tile_r, _LANES), lambda i, k: (i, k, 0))
    out_spec = pl.BlockSpec((tile_n, _SUBLANES, _LANES), lambda i, k: (i, 0, 0))
    out_sd = jax.ShapeDtypeStruct((n, _SUBLANES, _LANES), jnp.float32)

    kernel = _make_partial_sums_kernel(tile_r, r_rows, num_k)

    inter, denom, surf = pl.pallas_call(
        kernel,
        out_shape=(out_sd, out_sd, out_sd),
        grid_spec=pltpu.PrefetchScalarGridSpec(
            num_scalar_prefetch=0,
            grid=(n_blocks, num_k),
            in_specs=[in_spec, in_spec, in_spec],
            out_specs=[out_spec, out_spec, out_spec],
        ),
        # TODO(synk): on v7x, marking the leading axis pltpu.CORE_PARALLEL (or
        # using pl.core_map over a 2-TC mesh) would split the stream across
        # both TensorCores; plain "parallel" is kept here for portability.
        compiler_params=pltpu.CompilerParams(
            dimension_semantics=("parallel", "arbitrary"),
            vmem_limit_bytes=int(vmem_limit)),
    )(p3, t3, d3)

    return inter.sum(axis=(1, 2)), denom.sum(axis=(1, 2)), surf.sum()


# ---------------------------------------------------------------------------
# Loss wrappers (forward semantics of the PyTorch module).
# ---------------------------------------------------------------------------
def dice_surface_terms(predict, target, *, eps=1e-7, dist_dtype=jnp.bfloat16,
                       _max_rows_per_block=None):
    """Returns (binary_dice_loss, surface_loss) for [N, 1, H, W] inputs."""
    if predict.shape[0] != target.shape[0]:
        raise ValueError(
            f"Predicted Tensor must have same shape as target Tensor: "
            f"Predicted shape ({predict.shape[0]}) != ({target.shape[0]}) Target shape")
    if predict.shape[1] != 1 or target.shape[1] != 1:
        raise ValueError(
            f"Predicted and target Tensor must have shape [N, 1, H, W]. "
            f"Got predicted: {predict.shape} and target: {target.shape}")

    n, c, h, w = predict.shape
    l = c * h * w

    # Dist map stored at bf16 (halves that stream's HBM read; fused into its
    # producer).  predict/target travel at their native dtype and are upcast
    # to f32 inside the kernel.
    dist = _one_hot2dist(target).astype(dist_dtype)

    p2 = predict.reshape(n, l)
    t2 = target.reshape(n, l)
    d2 = dist.reshape(n, l)

    inter, denom, surf = _partial_sums(p2, t2, d2,
                                       max_rows_per_block=_max_rows_per_block)

    dice = (2.0 * inter + eps) / (denom + eps)
    dice_loss = jnp.mean(1.0 - dice)
    surface_loss = surf / jnp.float32(n * l)
    return dice_loss, surface_loss


def dice_surface_loss(predict, target, *, alpha=1.0, eps=1e-7):
    dice, surface = dice_surface_terms(predict, target, eps=eps)
    return dice + alpha * surface


class DiceSurfaceLoss:
    """Mirror of the PyTorch DiceSurfaceLoss: alpha scheduling is host-side
    Python state (as in the nn.Module)."""

    def __init__(self, alpha=1.0, max_alpha=0.9, strategy="constant",
                 inc_reb_rate_iter=10, eps=1e-7):
        if strategy not in ("constant", "increase", "rebalance"):
            raise ValueError(
                "strategy must be one of ['constant', 'increase', 'rebalance']."
                f"Got {strategy}")
        self.alpha = 0.0 if strategy in ("increase", "rebalance") else alpha
        self.max_alpha = max_alpha
        self.strategy = strategy
        self.inc_reb_rate = inc_reb_rate_iter
        self.iter = 0
        self.eps = eps

    def __call__(self, prob, label):
        dice, surface = dice_surface_terms(prob, label, eps=self.eps)
        if self.strategy == "constant":
            return dice + self.alpha * surface
        if self.strategy == "increase":
            if self.iter % self.inc_reb_rate == 0:
                self.alpha += 0.01
            self.alpha = min(self.alpha, self.max_alpha)
            self.iter += 1
            return dice + self.alpha * surface
        # rebalance
        if self.iter % self.inc_reb_rate == 0:
            if self.iter < 100:
                self.alpha += 0.005
            elif self.iter <= 300:
                self.alpha += 0.01
            else:
                self.alpha += 0.02
        self.alpha = min(self.alpha, self.max_alpha)
        self.iter += 1
        return (1.0 - self.alpha) * dice + self.alpha * surface


# ---------------------------------------------------------------------------
# Pure-JAX reference and smoke test.
# ---------------------------------------------------------------------------
def _reference(prob, label, alpha=1.0, eps=1e-7, dist_dtype=jnp.bfloat16):
    n = prob.shape[0]
    p = prob.reshape(n, -1).astype(jnp.float32)
    t = label.reshape(n, -1).astype(jnp.float32)
    inter = jnp.sum(p * t, axis=1)
    dice = (2.0 * inter + eps) / (jnp.sum(t, axis=1) + jnp.sum(p, axis=1) + eps)
    dice_loss = jnp.mean(1.0 - dice)
    dist = _one_hot2dist(label).astype(dist_dtype).astype(jnp.float32)
    surface = jnp.mean(prob.astype(jnp.float32) * dist)
    return dice_loss + alpha * surface


if __name__ == "__main__":
    key = jax.random.PRNGKey(0)
    k1, k2, k3, k4 = jax.random.split(key, 4)

    # Test 1: module-shaped small input (single chunk, no row masking).
    N, C, H, W = 2, 1, 16, 16      # module requires C == 1
    predict = jax.nn.sigmoid(jax.random.normal(k1, (N, C, H, W), jnp.float32))
    target = (jax.random.uniform(k2, (N, C, H, W)) > 0.5).astype(jnp.float32)

    loss_fn = DiceSurfaceLoss()    # constant strategy, alpha = 1
    loss = jax.block_until_ready(loss_fn(predict, target))
    ref = jax.block_until_ready(_reference(predict, target, alpha=1.0))
    assert jnp.allclose(loss, ref, atol=1e-5, rtol=1e-5), (loss, ref)

    # Test 2: multi-block / multi-chunk grid with ragged tail (exercises the
    # in-kernel row masking and the vreg-shaped accumulator path).
    N2, H2, W2 = 16, 48, 48        # L = 2304 -> R = 18 rows, forced tile_r = 8
    p_big = jax.nn.sigmoid(jax.random.normal(k3, (N2, 1, H2, W2), jnp.float32))
    t_big = (jax.random.uniform(k4, (N2, 1, H2, W2)) > 0.5).astype(jnp.float32)
    d_l, s_l = dice_surface_terms(p_big, t_big, _max_rows_per_block=8)
    loss2 = jax.block_until_ready(d_l + 1.0 * s_l)
    ref2 = jax.block_until_ready(_reference(p_big, t_big, alpha=1.0))
    assert jnp.allclose(loss2, ref2, atol=1e-4, rtol=1e-4), (loss2, ref2)

    print("KERNEL_OK")
</pallas_src>

<mosaic_0001>
module attributes {stable_mosaic.version = 11 : i64} {
  func.func @kernel(%arg0: i32, %arg1: i32, %arg2: memref<2x2x128xf32, #tpu.memory_space<vmem>>, %arg3: memref<2x2x128xf32, #tpu.memory_space<vmem>>, %arg4: memref<2x2x128xbf16, #tpu.memory_space<vmem>>, %arg5: memref<2x8x128xf32, #tpu.memory_space<vmem>>, %arg6: memref<2x8x128xf32, #tpu.memory_space<vmem>>, %arg7: memref<2x8x128xf32, #tpu.memory_space<vmem>>) attributes {dimension_semantics = [#tpu.dimension_semantics<parallel>, #tpu.dimension_semantics<arbitrary>], iteration_bounds = array<i64: 1, 1>, scalar_prefetch = 0 : i64, scratch_operands = 0 : i64, tpu.core_type = #tpu.core_type<tc>, window_params = [{transform_indices = @transform_0, window_bounds = array<i64: 2, 2, 128>}, {transform_indices = @transform_1, window_bounds = array<i64: 2, 2, 128>}, {transform_indices = @transform_2, window_bounds = array<i64: 2, 2, 128>}, {transform_indices = @transform_3, window_bounds = array<i64: 2, 8, 128>}, {transform_indices = @transform_4, window_bounds = array<i64: 2, 8, 128>}, {transform_indices = @transform_5, window_bounds = array<i64: 2, 8, 128>}]} {
    %c0_i32 = arith.constant 0 : i32
    %0 = arith.cmpi eq, %arg1, %c0_i32 : i32
    %1 = arith.extui %0 : i1 to i32
    %c0_i32_0 = arith.constant 0 : i32
    %2 = arith.cmpi ne, %1, %c0_i32_0 : i32
    scf.if %2 {
      %cst_29 = arith.constant 0.000000e+00 : f32
      %25 = vector.broadcast %cst_29 : f32 to vector<2x8x128xf32>
      %c0_30 = arith.constant 0 : index
      %c0_31 = arith.constant 0 : index
      %c0_32 = arith.constant 0 : index
      %26 = vector.load %arg5[%c0_30, %c0_31, %c0_32] : memref<2x8x128xf32, #tpu.memory_space<vmem>>, vector<2x8x128xf32>
      tpu.vector_store %arg5[%c0_30, %c0_31, %c0_32], %25 {strides = array<i32>} : memref<2x8x128xf32, #tpu.memory_space<vmem>>, vector<2x8x128xf32>,
      %cst_33 = arith.constant 0.000000e+00 : f32
      %27 = vector.broadcast %cst_33 : f32 to vector<2x8x128xf32>
      %c0_34 = arith.constant 0 : index
      %c0_35 = arith.constant 0 : index
      %c0_36 = arith.constant 0 : index
      %28 = vector.load %arg6[%c0_34, %c0_35, %c0_36] : memref<2x8x128xf32, #tpu.memory_space<vmem>>, vector<2x8x128xf32>
      tpu.vector_store %arg6[%c0_34, %c0_35, %c0_36], %27 {strides = array<i32>} : memref<2x8x128xf32, #tpu.memory_space<vmem>>, vector<2x8x128xf32>,
      %cst_37 = arith.constant 0.000000e+00 : f32
      %29 = vector.broadcast %cst_37 : f32 to vector<2x8x128xf32>
      %c0_38 = arith.constant 0 : index
      %c0_39 = arith.constant 0 : index
      %c0_40 = arith.constant 0 : index
      %30 = vector.load %arg7[%c0_38, %c0_39, %c0_40] : memref<2x8x128xf32, #tpu.memory_space<vmem>>, vector<2x8x128xf32>
      tpu.vector_store %arg7[%c0_38, %c0_39, %c0_40], %29 {strides = array<i32>} : memref<2x8x128xf32, #tpu.memory_space<vmem>>, vector<2x8x128xf32>,
    } else {
    }
    %c0 = arith.constant 0 : index
    %c0_1 = arith.constant 0 : index
    %c0_2 = arith.constant 0 : index
    %3 = vector.load %arg2[%c0, %c0_1, %c0_2] : memref<2x2x128xf32, #tpu.memory_space<vmem>>, vector<2x2x128xf32>
    %c0_3 = arith.constant 0 : index
    %c0_4 = arith.constant 0 : index
    %c0_5 = arith.constant 0 : index
    %4 = vector.load %arg3[%c0_3, %c0_4, %c0_5] : memref<2x2x128xf32, #tpu.memory_space<vmem>>, vector<2x2x128xf32>
    %c0_6 = arith.constant 0 : index
    %c0_7 = arith.constant 0 : index
    %c0_8 = arith.constant 0 : index
    %5 = vector.load %arg4[%c0_6, %c0_7, %c0_8] : memref<2x2x128xbf16, #tpu.memory_space<vmem>>, vector<2x2x128xbf16>
    %6 = arith.extf %5 : vector<2x2x128xbf16> to vector<2x2x128xf32>
    %c0_9 = arith.constant 0 : index
    %c0_10 = arith.constant 0 : index
    %c0_11 = arith.constant 0 : index
    %7 = vector.load %arg5[%c0_9, %c0_10, %c0_11] : memref<2x8x128xf32, #tpu.memory_space<vmem>>, vector<2x1x128xf32>
    %8 = arith.mulf %3, %4 : vector<2x2x128xf32>
    %cst = arith.constant dense<0.000000e+00> : vector<2x128xf32>
    %9 = vector.multi_reduction <add>, %8, %cst [1] : vector<2x2x128xf32> to vector<2x128xf32>
    %10 = vector.shape_cast %9 : vector<2x128xf32> to vector<2x1x128xf32>
    %11 = arith.addf %7, %10 : vector<2x1x128xf32>
    %c0_12 = arith.constant 0 : index
    %c0_13 = arith.constant 0 : index
    %c0_14 = arith.constant 0 : index
    %12 = vector.load %arg5[%c0_12, %c0_13, %c0_14] : memref<2x8x128xf32, #tpu.memory_space<vmem>>, vector<2x1x128xf32>
    tpu.vector_store %arg5[%c0_12, %c0_13, %c0_14], %11 {strides = array<i32>} : memref<2x8x128xf32, #tpu.memory_space<vmem>>, vector<2x1x128xf32>,
    %c0_15 = arith.constant 0 : index
    %c0_16 = arith.constant 0 : index
    %c0_17 = arith.constant 0 : index
    %13 = vector.load %arg6[%c0_15, %c0_16, %c0_17] : memref<2x8x128xf32, #tpu.memory_space<vmem>>, vector<2x1x128xf32>
    %14 = arith.addf %3, %4 : vector<2x2x128xf32>
    %cst_18 = arith.constant dense<0.000000e+00> : vector<2x128xf32>
    %15 = vector.multi_reduction <add>, %14, %cst_18 [1] : vector<2x2x128xf32> to vector<2x128xf32>
    %16 = vector.shape_cast %15 : vector<2x128xf32> to vector<2x1x128xf32>
    %17 = arith.addf %13, %16 : vector<2x1x128xf32>
    %c0_19 = arith.constant 0 : index
    %c0_20 = arith.constant 0 : index
    %c0_21 = arith.constant 0 : index
    %18 = vector.load %arg6[%c0_19, %c0_20, %c0_21] : memref<2x8x128xf32, #tpu.memory_space<vmem>>, vector<2x1x128xf32>
    tpu.vector_store %arg6[%c0_19, %c0_20, %c0_21], %17 {strides = array<i32>} : memref<2x8x128xf32, #tpu.memory_space<vmem>>, vector<2x1x128xf32>,
    %c0_22 = arith.constant 0 : index
    %c0_23 = arith.constant 0 : index
    %c0_24 = arith.constant 0 : index
    %19 = vector.load %arg7[%c0_22, %c0_23, %c0_24] : memref<2x8x128xf32, #tpu.memory_space<vmem>>, vector<2x1x128xf32>
    %20 = arith.mulf %3, %6 : vector<2x2x128xf32>
    %cst_25 = arith.constant dense<0.000000e+00> : vector<2x128xf32>
    %21 = vector.multi_reduction <add>, %20, %cst_25 [1] : vector<2x2x128xf32> to vector<2x128xf32>
    %22 = vector.shape_cast %21 : vector<2x128xf32> to vector<2x1x128xf32>
    %23 = arith.addf %19, %22 : vector<2x1x128xf32>
    %c0_26 = arith.constant 0 : index
    %c0_27 = arith.constant 0 : index
    %c0_28 = arith.constant 0 : index
    %24 = vector.load %arg7[%c0_26, %c0_27, %c0_28] : memref<2x8x128xf32, #tpu.memory_space<vmem>>, vector<2x1x128xf32>
    tpu.vector_store %arg7[%c0_26, %c0_27, %c0_28], %23 {strides = array<i32>} : memref<2x8x128xf32, #tpu.memory_space<vmem>>, vector<2x1x128xf32>,
    return
  }
  func.func @transform_0(%arg0: i32, %arg1: i32) -> (i32, i32, i32) {
    %c0_i32 = arith.constant 0 : i32
    %c0_i32_0 = arith.constant 0 : i32
    return %arg0, %arg1, %c0_i32 : i32, i32, i32
  }
  func.func @transform_1(%arg0: i32, %arg1: i32) -> (i32, i32, i32) {
    %c0_i32 = arith.constant 0 : i32
    %c0_i32_0 = arith.constant 0 : i32
    return %arg0, %arg1, %c0_i32 : i32, i32, i32
  }
  func.func @transform_2(%arg0: i32, %arg1: i32) -> (i32, i32, i32) {
    %c0_i32 = arith.constant 0 : i32
    %c0_i32_0 = arith.constant 0 : i32
    return %arg0, %arg1, %c0_i32 : i32, i32, i32
  }
  func.func @transform_3(%arg0: i32, %arg1: i32) -> (i32, i32, i32) {
    %c0_i32 = arith.constant 0 : i32
    %c0_i32_0 = arith.constant 0 : i32
    %c0_i32_1 = arith.constant 0 : i32
    return %arg0, %c0_i32, %c0_i32_0 : i32, i32, i32
  }
  func.func @transform_4(%arg0: i32, %arg1: i32) -> (i32, i32, i32) {
    %c0_i32 = arith.constant 0 : i32
    %c0_i32_0 = arith.constant 0 : i32
    %c0_i32_1 = arith.constant 0 : i32
    return %arg0, %c0_i32, %c0_i32_0 : i32, i32, i32
  }
  func.func @transform_5(%arg0: i32, %arg1: i32) -> (i32, i32, i32) {
    %c0_i32 = arith.constant 0 : i32
    %c0_i32_0 = arith.constant 0 : i32
    %c0_i32_1 = arith.constant 0 : i32
    return %arg0, %c0_i32, %c0_i32_0 : i32, i32, i32
  }
}

</mosaic_0001>

<bundles_post_ra>
// kernel: tpu_custom_call.1
= control target key start
LH: loop header
LB: loop body
LE: loop exit
PB: predicated region body
PF: predicated region fallthrough
CT: control target
= control target key end

     0   :  { %11 = vsyncpa [#allocation3], 0  ;;  %s444_s0 = inlined_call_operand.hbm [shape: f32[2,2,128], index: 0, kind: input, shape index: {}]   ;;  %s445_s1 = inlined_call_operand.hbm [shape: f32[2,2,128], index: 1, kind: input, shape index: {}]   ;;  %s446_s2 = inlined_call_operand.hbm [shape: bf16[2,2,128], index: 2, kind: input, shape index: {}]   ;;  %s447_s3 = inlined_call_operand.hbm [shape: f32[2,8,128], index: 3, kind: output, shape index: {0}]   ;;  %s448_s4 = inlined_call_operand.hbm [shape: f32[2,8,128], index: 4, kind: output, shape index: {1}]   ;;  %s449_s5 = inlined_call_operand.hbm [shape: f32[2,8,128], index: 5, kind: output, shape index: {2}]  }
   0x1   :  { %12 = vsyncpa [#allocation6], 0 }
   0x2   :  { %13 = vsyncpa [#allocation4], 0 }
   0x3   :  { %14 = vsyncpa [#allocation10], 0  ;;  %s32_s20 = sshll.u32 %s445_s1, 4  ;;  %s371_s21 = smov [#allocation5]   ;;  %s33_s20 = int_to_ptr.hbm [resolvable:$true] %s32_s20 }
   0x4   :  { %s34_s22 = sshll.u32 %s371_s21, 4  ;;  %s19_s25 = sshll.u32 %s444_s0, 4  ;;  %s35_s22 = int_to_ptr.vmem [resolvable:$true] %s34_s22  ;;  %s20_s25 = int_to_ptr.hbm [resolvable:$true] %s19_s25 }
   0x5   :  { %s372_s26 = smov 32   ;;  %s373_s27 = smov 2  }
   0x6   :  { %40 = dma.hbm_to_vmem [thread:$0]  %s33_s20, 64, %s35_s22, [#allocation6], %s372_s26, %s372_s26, %s373_s27  }
   0x7   :  { %s374_s28 = smov [#allocation2]   ;;  %s45_s7 = sshll.u32 %s446_s2, 4  ;;  %s46_s7 = int_to_ptr.hbm [resolvable:$true] %s45_s7 }
   0x8   :  { %s21_s29 = sshll.u32 %s374_s28, 4  ;;  %s375_s1 = smov [#allocation7]   ;;  %s22_s29 = int_to_ptr.vmem [resolvable:$true] %s21_s29 }
   0x9   :  { %27 = dma.hbm_to_vmem [thread:$0]  %s20_s25, 64, %s22_s29, [#allocation3], %s372_s26, %s372_s26, %s373_s27  }
   0xa   :  { %s47_s8 = sshll.u32 %s375_s1, 4  ;;  %s376_s9 = smov 16   ;;  %s48_s8 = int_to_ptr.vmem [resolvable:$true] %s47_s8 }
   0xb   :  { %s377_s10 = smov 1  }
   0xc   :  { %53 = dma.hbm_to_vmem [thread:$0]  %s46_s7, 32, %s48_s8, [#allocation6], %s376_s9, %s376_s9, %s377_s10  }
   0xd   :  { %363 = dma.done.wait [#allocation3], 64  }
   0xe   :  { %364 = vsyncadd [#allocation3], 4294967232 }
   0xf   :  { %365 = dma.done.wait [#allocation6], 96  }
  0x10   :  { %366 = vsyncadd [#allocation6], 4294967200  ;;  %v378_v0 = vmov 0.0   ;;  %vm88_vm0 = vcmask 1041408   ;;  %v76_v1 = vld [vmem:[#allocation2] sm:$0x3] }
  0x11   :  { %72 = vst [vmem:[#allocation9] sm:$0xff] %v378_v0  ;;  %v78_v2 = vld [vmem:[#allocation5] sm:$0x3]  ;;  %v77_v3 = vld [vmem:[#allocation2 + $0x2] sm:$0x3]  ;;  %s379_s0 = smov [#allocation9]  }
  0x12   :  { %70 = vst [vmem:[#allocation8] sm:$0xff] %v378_v0  ;;  %v109_v4 = vadd.f32 %v78_v2, %v76_v1  ;;  %v79_v5 = vld [vmem:[#allocation5 + $0x2] sm:$0x3]  ;;  %v86_v6 = vmul.f32 %v78_v2, %v76_v1  ;;  %v80_v7 = vld [vmem:[#allocation7] sm:$0x1]  ;;  %s429_s2 = sshll.u32 %s379_s0, 4  ;;  %s169_s2 = int_to_ptr.vmem [resolvable:$true] %s429_s2 }
  0x13   :  { %71 = vst [vmem:[#allocation8 + $0x8] sm:$0xff] %v378_v0  ;;  %v110_v8 = vadd.f32 %v79_v5, %v77_v3  ;;  %v87_v9 = vmul.f32 %v79_v5, %v77_v3  ;;  %v82_v10 = vunpack.c.l.bf16 %v80_v7  ;;  %v81_v11 = vld [vmem:[#allocation7 + $0x1] sm:$0x1]  ;;  %s170_s13 = sshll.u32 %s448_s4, 4  ;;  %s380_s14 = smov [#allocation8]   ;;  %s171_s13 = int_to_ptr.hbm [resolvable:$true] %s170_s13 }
  0x14   :  { %73 = vst [vmem:[#allocation9 + $0x8] sm:$0xff] %v378_v0  ;;  %v111_v12 = vsel %vm88_vm0, %v109_v4, 0.0  ;;  %v89_v13 = vsel %vm88_vm0, %v86_v6, 0.0  ;;  %v83_v14 = vunpack.c.l.bf16 %v81_v11  ;;  %s434_s15 = sshll.u32 %s380_s14, 4  ;;  %s157_s18 = sshll.u32 %s447_s3, 4  ;;  %s156_s15 = int_to_ptr.vmem [resolvable:$true] %s434_s15  ;;  %s158_s18 = int_to_ptr.hbm [resolvable:$true] %s157_s18 }
  0x15   :  { %74 = vst [vmem:[#allocation11] sm:$0xff] %v378_v0  ;;  %v112_v15 = vrot.slane %v111_v12, 4  ;;  %v118_v16 = vsel %vm88_vm0, %v110_v8, 0.0  ;;  %v90_v17 = vrot.slane %v89_v13, 4  ;;  %v96_v18 = vsel %vm88_vm0, %v87_v9, 0.0  ;;  %s381_s4 = smov [#allocation11]  }
  0x16   :  { %75 = vst [vmem:[#allocation11 + $0x8] sm:$0xff] %v378_v0  ;;  %v119_v19 = vrot.slane %v118_v16, 4  ;;  %v97_v20 = vrot.slane %v96_v18, 4  ;;  %v131_v21 = vmul.f32 %v82_v10, %v76_v1  ;;  %v132_v22 = vmul.f32 %v83_v14, %v77_v3  ;;  %s181_s19 = sshll.u32 %s381_s4, 4  ;;  %s183_s22 = sshll.u32 %s449_s5, 4  ;;  %s182_s19 = int_to_ptr.vmem [resolvable:$true] %s181_s19  ;;  %s184_s22 = int_to_ptr.hbm [resolvable:$true] %s183_s22 }
  0x17   :  { %v113_v23 = vadd.f32 %v112_v15, %v111_v12  ;;  %v91_v24 = vadd.f32 %v90_v17, %v89_v13  ;;  %s382_s3 = smov 128   ;;  %s383_s23 = smov 8  }
  0x18   :  { %v120_v25 = vadd.f32 %v119_v19, %v118_v16  ;;  %v98_v26 = vadd.f32 %v97_v20, %v96_v18  ;;  %v133_v27 = vsel %vm88_vm0, %v131_v21, 0.0  ;;  %v140_v28 = vsel %vm88_vm0, %v132_v22, 0.0  ;;  %v107_v45 = vld [vmem:[#allocation9] sm:$0x1] }
  0x19   :  { %v114_v29 = vrot.slane %v113_v23, 2  ;;  %v92_v30 = vrot.slane %v91_v24, 2  ;;  %v134_v31 = vrot.slane %v133_v27, 4  ;;  %v141_v32 = vrot.slane %v140_v28, 4  ;;  %v84_v47 = vld [vmem:[#allocation8] sm:$0x1] }
  0x1a   :  { %v121_v33 = vrot.slane %v120_v25, 2  ;;  %v99_v34 = vrot.slane %v98_v26, 2  ;;  %v85_v52 = vld [vmem:[#allocation8 + $0x8] sm:$0x1] }
  0x1b   :  { %v115_v35 = vadd.f32 %v114_v29, %v113_v23  ;;  %v93_v36 = vadd.f32 %v92_v30, %v91_v24  ;;  %v135_v37 = vadd.f32 %v134_v31, %v133_v27  ;;  %v142_v38 = vadd.f32 %v141_v32, %v140_v28  ;;  %v108_v50 = vld [vmem:[#allocation9 + $0x8] sm:$0x1] }
  0x1c   :  { %v122_v39 = vadd.f32 %v121_v33, %v120_v25  ;;  %v100_v40 = vadd.f32 %v99_v34, %v98_v26  ;;  %v129_v63 = vld [vmem:[#allocation11] sm:$0x1] }
  0x1d   :  { %v116_v41 = vrot.slane %v115_v35, 1  ;;  %v94_v42 = vrot.slane %v93_v36, 1  ;;  %v136_v43 = vrot.slane %v135_v37, 2  ;;  %v143_v44 = vrot.slane %v142_v38, 2  ;;  %v130_v0 = vld [vmem:[#allocation11 + $0x8] sm:$0x1] }
  0x1e   :  { %v123_v46 = vrot.slane %v122_v39, 1  ;;  %v101_v48 = vrot.slane %v100_v40, 1 }
  0x1f   :  { %v117_v49 = vadd.f32 %v116_v41, %v115_v35  ;;  %v95_v51 = vadd.f32 %v94_v42, %v93_v36  ;;  %v137_v53 = vadd.f32 %v136_v43, %v135_v37  ;;  %v144_v54 = vadd.f32 %v143_v44, %v142_v38 }
  0x20   :  { %v124_v55 = vadd.f32 %v123_v46, %v122_v39  ;;  %v102_v56 = vadd.f32 %v101_v48, %v100_v40 }
  0x21   :  { %v125_v57 = vadd.f32 %v117_v49, %v107_v45  ;;  %v103_v58 = vadd.f32 %v95_v51, %v84_v47  ;;  %v138_v59 = vrot.slane %v137_v53, 1  ;;  %v145_v60 = vrot.slane %v144_v54, 1 }
  0x22   :  { %v126_v61 = vadd.f32 %v124_v55, %v108_v50  ;;  %v104_v62 = vadd.f32 %v102_v56, %v85_v52 }
  0x23   :  { %127 = vst [vmem:[#allocation9] sm:$0x1] %v125_v57  ;;  %v139_v1 = vadd.f32 %v138_v59, %v137_v53  ;;  %v146_v2 = vadd.f32 %v145_v60, %v144_v54 }
  0x24   :  { %128 = vst [vmem:[#allocation9 + $0x8] sm:$0x1] %v126_v61 }
  0x25   :  { %105 = vst [vmem:[#allocation8] sm:$0x1] %v103_v58  ;;  %v147_v3 = vadd.f32 %v139_v1, %v129_v63  ;;  %v148_v4 = vadd.f32 %v146_v2, %v130_v0  ;;  %176 = dma.vmem_to_hbm [thread:$0]  %s169_s2, 256, %s171_s13, [#allocation10], %s382_s3, %s382_s3, %s383_s23  }
  0x26   :  { %106 = vst [vmem:[#allocation8 + $0x8] sm:$0x1] %v104_v62 }
  0x27   :  { %149 = vst [vmem:[#allocation11] sm:$0x1] %v147_v3  ;;  %163 = dma.vmem_to_hbm [thread:$0]  %s156_s15, 256, %s158_s18, [#allocation4], %s382_s3, %s382_s3, %s383_s23  }
  0x28   :  { %150 = vst [vmem:[#allocation11 + $0x8] sm:$0x1] %v148_v4 }
  0x29   :  { %189 = dma.vmem_to_hbm [thread:$0]  %s182_s19, 256, %s184_s22, [#allocation10], %s382_s3, %s382_s3, %s383_s23  }
  0x2a   :  { %367 = dma.done.wait [#allocation4], 256  }
  0x2b   :  { %368 = vsyncadd [#allocation4], 4294967040 }
  0x2c   :  { %369 = dma.done.wait [#allocation10], 512  }
  0x2d   :  { %370 = vsyncadd [#allocation10], 4294966784 }
  0x2e   :  { %202 = vsyncpa [#allocation3], 1 }
  0x2f   :  { %203 = vsyncpa [#allocation6], 1 }
  0x30   :  { %204 = vsyncpa [#allocation4], 1 }
  0x31   :  { %205 = vsyncpa [#allocation10], 1 }

</bundles_post_ra>
